<compile_context>
chip_gen: v6e
topology: v6e:2x2x1
jax: 0.10.0
libtpu: 0.0.40
codegen_flags: <defaults>
</compile_context>

<pallas_src>
import math

import jax
import jax.numpy as jnp
from jax.experimental import pallas as pl
from jax.experimental.pallas import tpu as pltpu


N_FT = 64      # hidden width `n_ft` in the PyTorch module (routing: F -> 64 -> 128 -> 1)


# ----------------------------------------------------------------------------
# Pallas kernel: whole routing MLP fused (3 matmuls + bias/ReLU + sigmoid).
# Output is the TRANSPOSED gate row (1, tm) so the HBM store is lane-dense.
# ----------------------------------------------------------------------------
def _routing_mlp_kernel(x_ref, w1_ref, b1_ref, w2_ref, b2_ref, w3_ref, b3_ref,
                        gate_ref):
    # Layer 1 (+ folded BN1): (tm, F)bf16 @ (F, 64)bf16 -> (tm, 64)f32
    x = x_ref[...].astype(jnp.bfloat16)
    h = jnp.dot(x, w1_ref[...], preferred_element_type=jnp.float32) + b1_ref[...]
    h = jnp.maximum(h, 0.0).astype(jnp.bfloat16)

    # Layer 2 (+ folded BN2): (tm, 64)bf16 @ (64, 128)bf16 -> (tm, 128)f32
    h = jnp.dot(h, w2_ref[...], preferred_element_type=jnp.float32) + b2_ref[...]
    h = jnp.maximum(h, 0.0).astype(jnp.bfloat16)

    # Layer 3, transposed: (1, 128)bf16 . (tm, 128)bf16 contracting last dims
    # -> (1, tm)f32.  Keeps the batch on lanes -> lane-dense output store.
    z = jax.lax.dot_general(
        w3_ref[...], h,
        dimension_numbers=(((1,), (1,)), ((), ())),
        preferred_element_type=jnp.float32)
    z = z + b3_ref[0]                                   # scalar bias from SMEM

    # Sigmoid on a single (1, tm) row: epilogue cost is negligible now.
    gate_ref[...] = (1.0 / (1.0 + jnp.exp(-z))).astype(gate_ref.dtype)


# ----------------------------------------------------------------------------
# Wrapper
# ----------------------------------------------------------------------------
def _routing_pallas(t_ft, params):
    N, F = t_ft.shape
    n_ft = params["w1"].shape[1]        # 64
    c2 = params["w2"].shape[1]          # 128

    # Batch tiling:
    #   N <= 1024 : one grid step, block == full array (no alignment padding).
    #   N >  1024 : >= 2 evenly sized 512-aligned steps (megacore on v7x),
    #               capped at 2048 rows/step; ragged last block handled by
    #               Pallas (no jnp.pad of the input).
    if N <= 1024:
        tm = N
    else:
        half = -(-N // 2)                               # cdiv(N, 2)
        tm = min(2048, ((half + 511) // 512) * 512)
    grid = (pl.cdiv(N, tm),)

    out = pl.pallas_call(
        _routing_mlp_kernel,
        out_shape=jax.ShapeDtypeStruct((1, N), jnp.float32),
        grid=grid,
        in_specs=[
            pl.BlockSpec((tm, F), lambda i: (i, 0)),        # activations (f32)
            pl.BlockSpec((F, n_ft), lambda i: (0, 0)),      # W1 bf16 (BN1 folded)
            pl.BlockSpec((1, n_ft), lambda i: (0, 0)),      # b1 f32  (BN1 folded)
            pl.BlockSpec((n_ft, c2), lambda i: (0, 0)),     # W2 bf16 (BN2 folded)
            pl.BlockSpec((1, c2), lambda i: (0, 0)),        # b2 f32  (BN2 folded)
            pl.BlockSpec((1, c2), lambda i: (0, 0)),        # W3 row bf16 (1, 128)
            pl.BlockSpec(memory_space=pltpu.MemorySpace.SMEM),  # b3 scalar f32
        ],
        out_specs=pl.BlockSpec((1, tm), lambda i: (0, i)),  # transposed gate row
        compiler_params=pltpu.CompilerParams(
            dimension_semantics=("parallel",)),
    )(t_ft, params["w1"], params["b1"], params["w2"], params["b2"],
      params["w3"], params["b3"])

    return out.reshape(N, 1)            # (1, N) -> (N, 1), tiny reshape in XLA


@jax.jit
def b23_forward(params, s_ft, s_logits, t_ft, t_logits, y_one_hot):
    # Matches the PyTorch forward: only t_ft / t_logits are used.
    gate = _routing_pallas(t_ft, params)
    return gate, t_logits


# ----------------------------------------------------------------------------
# Parameter construction (mirrors the PyTorch module + init_weights)
# ----------------------------------------------------------------------------
def init_params(key, num_t_ft, n_ft=N_FT):
    ks = jax.random.split(key, 3)

    def xavier(k, fan_out, fan_in):       # torch Linear weight layout: (out, in)
        lim = math.sqrt(6.0 / (fan_in + fan_out))
        return jax.random.uniform(k, (fan_out, fan_in), jnp.float32, -lim, lim)

    # init_weights: xavier_uniform on Linear weights, bias filled with 0.01
    w1 = xavier(ks[0], n_ft, num_t_ft);   b1 = jnp.full((n_ft,), 0.01, jnp.float32)
    w2 = xavier(ks[1], 2 * n_ft, n_ft);   b2 = jnp.full((2 * n_ft,), 0.01, jnp.float32)
    w3 = xavier(ks[2], 1, 2 * n_ft);      b3 = jnp.full((1,), 0.01, jnp.float32)

    # Inference-mode BatchNorm1d fold (freshly constructed BN: gamma=1, beta=0,
    # running_mean=0, running_var=1, eps=1e-5).
    def bn_fold(w_t, b, c, gamma=None, beta=None, mean=None, var=None, eps=1e-5):
        gamma = jnp.ones((c,), jnp.float32) if gamma is None else gamma
        beta = jnp.zeros((c,), jnp.float32) if beta is None else beta
        mean = jnp.zeros((c,), jnp.float32) if mean is None else mean
        var = jnp.ones((c,), jnp.float32) if var is None else var
        scale = gamma * jax.lax.rsqrt(var + eps)
        w_eff = w_t * scale[None, :]
        b_eff = ((b - mean) * scale + beta).reshape(1, c)
        return w_eff, b_eff

    w1_eff, b1_eff = bn_fold(w1.T, b1, n_ft)
    w2_eff, b2_eff = bn_fold(w2.T, b2, 2 * n_ft)

    # Weights in bf16 (f32 accumulation in-kernel), biases in f32.
    # w3 stays in its torch row layout (1, 2*n_ft) for the transposed layer-3
    # matmul; b3 is a single f32 scalar kept in SMEM.
    return {"w1": w1_eff.astype(jnp.bfloat16), "b1": b1_eff,
            "w2": w2_eff.astype(jnp.bfloat16), "b2": b2_eff,
            "w3": w3.astype(jnp.bfloat16),     "b3": b3}


# ----------------------------------------------------------------------------
if __name__ == "__main__":
    key = jax.random.PRNGKey(0)
    k_param, k_data = jax.random.split(key)

    batch, num_s_ft, num_t_ft, n_labels = 8, 64, 64, 10
    params = init_params(k_param, num_t_ft)

    kd = jax.random.split(k_data, 5)
    s_ft = jax.random.normal(kd[0], (batch, num_s_ft), jnp.float32)
    s_logits = jax.random.normal(kd[1], (batch, n_labels), jnp.float32)
    t_ft = jax.random.normal(kd[2], (batch, num_t_ft), jnp.float32)
    t_logits = jax.random.normal(kd[3], (batch, n_labels), jnp.float32)
    y_one_hot = jax.nn.one_hot(
        jax.random.randint(kd[4], (batch,), 0, n_labels), n_labels)

    gate, out_logits = b23_forward(params, s_ft, s_logits, t_ft, t_logits,
                                   y_one_hot)
    jax.block_until_ready((gate, out_logits))

    assert gate.shape == (batch, 1)
    assert out_logits.shape == (batch, n_labels)
    assert bool(jnp.all((gate >= 0.0) & (gate <= 1.0)))
    assert jnp.array_equal(out_logits, t_logits)

    # Plain-JAX f32 reference of the folded MLP (kernel uses bf16 matmuls with
    # f32 accumulation, hence the loose tolerance).
    def ref_gate(x, p):
        w1 = p["w1"].astype(jnp.float32)
        w2 = p["w2"].astype(jnp.float32)
        w3 = p["w3"].astype(jnp.float32)
        h = jnp.maximum(x @ w1 + p["b1"], 0.0)
        h = jnp.maximum(h @ w2 + p["b2"], 0.0)
        z = h @ w3.T + p["b3"]
        return 1.0 / (1.0 + jnp.exp(-z))

    ref = ref_gate(t_ft, params)
    assert jnp.allclose(gate, ref, atol=2e-2, rtol=2e-2), \
        float(jnp.max(jnp.abs(gate - ref)))

    # Also exercise the multi-step (megacore) / ragged-last-block path.
    big_n = 2500
    t_ft_big = jax.random.normal(kd[2], (big_n, num_t_ft), jnp.float32)
    gate_big = jax.jit(_routing_pallas)(t_ft_big, params)
    jax.block_until_ready(gate_big)
    assert gate_big.shape == (big_n, 1)
    assert jnp.allclose(gate_big, ref_gate(t_ft_big, params),
                        atol=2e-2, rtol=2e-2)

    print("KERNEL_OK")
</pallas_src>

<mosaic_0001>
module attributes {stable_mosaic.version = 11 : i64} {
  func.func @_routing_mlp_kernel(%arg0: i32, %arg1: memref<8x64xf32, #tpu.memory_space<vmem>>, %arg2: memref<64x64xbf16, #tpu.memory_space<vmem>>, %arg3: memref<1x64xf32, #tpu.memory_space<vmem>>, %arg4: memref<64x128xbf16, #tpu.memory_space<vmem>>, %arg5: memref<1x128xf32, #tpu.memory_space<vmem>>, %arg6: memref<1x128xbf16, #tpu.memory_space<vmem>>, %arg7: memref<1xf32, #tpu.memory_space<smem>>, %arg8: memref<1x8xf32, #tpu.memory_space<vmem>>) attributes {dimension_semantics = [#tpu.dimension_semantics<parallel>], iteration_bounds = array<i64: 1>, scalar_prefetch = 0 : i64, scratch_operands = 0 : i64, tpu.core_type = #tpu.core_type<tc>, window_params = [{transform_indices = @transform_0, window_bounds = array<i64: 8, 64>}, {pipeline_mode = #tpu.pipeline_mode<synchronous>, transform_indices = @transform_1, window_bounds = array<i64: 64, 64>}, {pipeline_mode = #tpu.pipeline_mode<synchronous>, transform_indices = @transform_2, window_bounds = array<i64: 1, 64>}, {pipeline_mode = #tpu.pipeline_mode<synchronous>, transform_indices = @transform_3, window_bounds = array<i64: 64, 128>}, {pipeline_mode = #tpu.pipeline_mode<synchronous>, transform_indices = @transform_4, window_bounds = array<i64: 1, 128>}, {pipeline_mode = #tpu.pipeline_mode<synchronous>, transform_indices = @transform_5, window_bounds = array<i64: 1, 128>}, {transform_indices = @transform_6, window_bounds = array<i64: 1>}, {transform_indices = @transform_7, window_bounds = array<i64: 1, 8>}]} {
    %c0 = arith.constant 0 : index
    %c0_0 = arith.constant 0 : index
    %0 = vector.load %arg1[%c0, %c0_0] : memref<8x64xf32, #tpu.memory_space<vmem>>, vector<8x64xf32>
    %1 = arith.truncf %0 : vector<8x64xf32> to vector<8x64xbf16>
    %c0_1 = arith.constant 0 : index
    %c0_2 = arith.constant 0 : index
    %2 = vector.load %arg2[%c0_1, %c0_2] : memref<64x64xbf16, #tpu.memory_space<vmem>>, vector<64x64xbf16>
    %cst = arith.constant dense<0.000000e+00> : vector<8x64xf32>
    %3 = tpu.matmul %1, %2, %cst {dimension_numbers = #tpu.dot_dimension_numbers<[1], [0], [0], [1], [0, 0, 1, 1], [], []>} : vector<8x64xbf16>, vector<64x64xbf16>, vector<8x64xf32> -> vector<8x64xf32>
    %c0_3 = arith.constant 0 : index
    %c0_4 = arith.constant 0 : index
    %4 = vector.load %arg3[%c0_3, %c0_4] : memref<1x64xf32, #tpu.memory_space<vmem>>, vector<1x64xf32>
    %5 = vector.broadcast %4 : vector<1x64xf32> to vector<8x64xf32>
    %6 = arith.addf %3, %5 : vector<8x64xf32>
    %cst_5 = arith.constant 0.000000e+00 : f32
    %7 = vector.broadcast %cst_5 : f32 to vector<8x64xf32>
    %8 = arith.maximumf %6, %7 : vector<8x64xf32>
    %9 = arith.truncf %8 : vector<8x64xf32> to vector<8x64xbf16>
    %c0_6 = arith.constant 0 : index
    %c0_7 = arith.constant 0 : index
    %10 = vector.load %arg4[%c0_6, %c0_7] : memref<64x128xbf16, #tpu.memory_space<vmem>>, vector<64x128xbf16>
    %cst_8 = arith.constant dense<0.000000e+00> : vector<8x128xf32>
    %11 = tpu.matmul %9, %10, %cst_8 {dimension_numbers = #tpu.dot_dimension_numbers<[1], [0], [0], [1], [0, 0, 1, 1], [], []>} : vector<8x64xbf16>, vector<64x128xbf16>, vector<8x128xf32> -> vector<8x128xf32>
    %c0_9 = arith.constant 0 : index
    %c0_10 = arith.constant 0 : index
    %12 = vector.load %arg5[%c0_9, %c0_10] : memref<1x128xf32, #tpu.memory_space<vmem>>, vector<1x128xf32>
    %13 = vector.broadcast %12 : vector<1x128xf32> to vector<8x128xf32>
    %14 = arith.addf %11, %13 : vector<8x128xf32>
    %cst_11 = arith.constant 0.000000e+00 : f32
    %15 = vector.broadcast %cst_11 : f32 to vector<8x128xf32>
    %16 = arith.maximumf %14, %15 : vector<8x128xf32>
    %17 = arith.truncf %16 : vector<8x128xf32> to vector<8x128xbf16>
    %c0_12 = arith.constant 0 : index
    %c0_13 = arith.constant 0 : index
    %18 = vector.load %arg6[%c0_12, %c0_13] : memref<1x128xbf16, #tpu.memory_space<vmem>>, vector<1x128xbf16>
    %cst_14 = arith.constant dense<0.000000e+00> : vector<1x8xf32>
    %19 = tpu.matmul %18, %17, %cst_14 {dimension_numbers = #tpu.dot_dimension_numbers<[1], [1], [0], [0], [0, 0, 1, 0], [], []>} : vector<1x128xbf16>, vector<8x128xbf16>, vector<1x8xf32> -> vector<1x8xf32>
    %c0_15 = arith.constant 0 : index
    %20 = memref.load %arg7[%c0_15] : memref<1xf32, #tpu.memory_space<smem>>
    %21 = vector.broadcast %20 : f32 to vector<1x8xf32>
    %22 = arith.addf %19, %21 : vector<1x8xf32>
    %cst_16 = arith.constant 0.000000e+00 : f32
    %23 = vector.broadcast %cst_16 : f32 to vector<1x8xf32>
    %24 = arith.subf %23, %22 : vector<1x8xf32>
    %25 = math.exp %24 : vector<1x8xf32>
    %cst_17 = arith.constant 1.000000e+00 : f32
    %26 = vector.broadcast %cst_17 : f32 to vector<1x8xf32>
    %27 = arith.addf %26, %25 : vector<1x8xf32>
    %cst_18 = arith.constant 1.000000e+00 : f32
    %28 = vector.broadcast %cst_18 : f32 to vector<1x8xf32>
    %29 = arith.divf %28, %27 : vector<1x8xf32>
    %c0_19 = arith.constant 0 : index
    %c0_20 = arith.constant 0 : index
    %30 = vector.load %arg8[%c0_19, %c0_20] : memref<1x8xf32, #tpu.memory_space<vmem>>, vector<1x8xf32>
    tpu.vector_store %arg8[%c0_19, %c0_20], %29 {strides = array<i32>} : memref<1x8xf32, #tpu.memory_space<vmem>>, vector<1x8xf32>,
    return
  }
  func.func @transform_0(%arg0: i32) -> (i32, i32) {
    %c0_i32 = arith.constant 0 : i32
    %c0_i32_0 = arith.constant 0 : i32
    return %arg0, %c0_i32 : i32, i32
  }
  func.func @transform_1(%arg0: i32) -> (i32, i32) {
    %c0_i32 = arith.constant 0 : i32
    %c0_i32_0 = arith.constant 0 : i32
    %c0_i32_1 = arith.constant 0 : i32
    return %c0_i32, %c0_i32_0 : i32, i32
  }
  func.func @transform_2(%arg0: i32) -> (i32, i32) {
    %c0_i32 = arith.constant 0 : i32
    %c0_i32_0 = arith.constant 0 : i32
    %c0_i32_1 = arith.constant 0 : i32
    return %c0_i32, %c0_i32_0 : i32, i32
  }
  func.func @transform_3(%arg0: i32) -> (i32, i32) {
    %c0_i32 = arith.constant 0 : i32
    %c0_i32_0 = arith.constant 0 : i32
    %c0_i32_1 = arith.constant 0 : i32
    return %c0_i32, %c0_i32_0 : i32, i32
  }
  func.func @transform_4(%arg0: i32) -> (i32, i32) {
    %c0_i32 = arith.constant 0 : i32
    %c0_i32_0 = arith.constant 0 : i32
    %c0_i32_1 = arith.constant 0 : i32
    return %c0_i32, %c0_i32_0 : i32, i32
  }
  func.func @transform_5(%arg0: i32) -> (i32, i32) {
    %c0_i32 = arith.constant 0 : i32
    %c0_i32_0 = arith.constant 0 : i32
    %c0_i32_1 = arith.constant 0 : i32
    return %c0_i32, %c0_i32_0 : i32, i32
  }
  func.func @transform_6(%arg0: i32) -> i32 {
    %c0_i32 = arith.constant 0 : i32
    %c0_i32_0 = arith.constant 0 : i32
    return %c0_i32 : i32
  }
  func.func @transform_7(%arg0: i32) -> (i32, i32) {
    %c0_i32 = arith.constant 0 : i32
    %c0_i32_0 = arith.constant 0 : i32
    return %c0_i32, %arg0 : i32, i32
  }
}

</mosaic_0001>

<bundles_post_ra>
// kernel: b23_forward.1
= control target key start
LH: loop header
LB: loop body
LE: loop exit
PB: predicated region body
PF: predicated region fallthrough
CT: control target
= control target key end

     0   :  { %13 = vsyncpa [#allocation4], 0  ;;  %s510_s0 = inlined_call_operand.vmem [shape: f32[8,64], index: 0, kind: input, shape index: {}]   ;;  %s511_s1 = inlined_call_operand.hbm [shape: bf16[64,64], index: 1, kind: input, shape index: {}]   ;;  %s512_s2 = inlined_call_operand.vmem [shape: f32[1,64], index: 2, kind: input, shape index: {}]   ;;  %s513_s3 = inlined_call_operand.hbm [shape: bf16[64,128], index: 3, kind: input, shape index: {}]   ;;  %s514_s4 = inlined_call_operand.vmem [shape: f32[1,128], index: 4, kind: input, shape index: {}]   ;;  %s515_s5 = inlined_call_operand.vmem [shape: bf16[1,128], index: 5, kind: input, shape index: {}]   ;;  %s516_s6 = inlined_call_operand.<no memory space> [shape: f32[1], index: 6, kind: input, shape index: {}]   ;;  %s517_s7 = inlined_call_operand.hbm [shape: f32[1,8], index: 7, kind: output, shape index: {}]  }
   0x1   :  { %14 = vsyncpa [#allocation7], 0 }
   0x2   :  { %15 = vsyncpa [#allocation5], 0  ;;  %s434_s24 = smov [#allocation3]  }
   0x3   :  { %s23_s25 = sshll.u32 %s434_s24, 4  ;;  %s24_s25 = int_to_ptr.vmem [resolvable:$true] %s23_s25 }
   0x4   :  { %s376_s26 = scalar_lea.vmem %s24_s25, 512  ;;  %p381_p1 = scmp.lt.s32.totalorder %s24_s25, %s24_s25 }
   0x5   :  { %p377_p0 = scmp.ne.s32.totalorder %s24_s25, %s376_s26  ;;  %p382_p2 = scmp.lt.s32.totalorder %s376_s26, %s376_s26 }
   0x7   :  { %p383_p3 = por %p382_p2, %p381_p1 }
   0x9   :  { %p384_p4 = pnand %p383_p3, %p377_p0 }
   0xb   :  { %387 = shalt.err (!%p384_p4)
}
   0xc   :  { %s435_s27 = smov 64   ;;  %s436_s28 = smov 4  }
   0xd   :  { %29 = dma.hbm_to_vmem [thread:$0]  %s511_s1, 512, %s24_s25, [#allocation4], %s435_s27, %s435_s27, %s436_s28  }
   0xe   :  { %s437_s8 = smov [#allocation6]  }
   0xf   :  { %s37_s9 = sshll.u32 %s437_s8, 4  ;;  %s38_s9 = int_to_ptr.vmem [resolvable:$true] %s37_s9 }
  0x10   :  { %s396_s10 = scalar_lea.vmem %s38_s9, 512  ;;  %p401_p6 = scmp.lt.s32.totalorder %s38_s9, %s38_s9 }
  0x11   :  { %p397_p5 = scmp.ne.s32.totalorder %s38_s9, %s396_s10  ;;  %p402_p7 = scmp.lt.s32.totalorder %s396_s10, %s396_s10 }
  0x13   :  { %p403_p8 = por %p402_p7, %p401_p6 }
  0x15   :  { %p404_p9 = pnand %p403_p8, %p397_p5 }
  0x17   :  { %407 = shalt.err (!%p404_p9)
}
  0x18   :  { %43 = dma.hbm_to_vmem [thread:$0]  %s513_s3, 512, %s38_s9, [#allocation7], %s435_s27, %s435_s27, %s436_s28  }
  0x19   :  { %428 = dma.done.wait [#allocation4], 512  }
  0x1a   :  { %429 = vsyncadd [#allocation4], 4294966784 }
  0x1b   :  { %430 = dma.done.wait [#allocation7], 512  }
  0x1c   :  { %431 = vsyncadd [#allocation7], 4294966784  ;;  %v438_v0 = vmov 0.0   ;;  %vm439_vm0 = vmmov 0   ;;  %v356_v1 = vld [vmem:[#allocation3 + $0x18] sm:$0xff]   ;;  %v357_v2 = vld [vmem:[#allocation3 + $0x10] sm:$0xff]   ;;  %v230_v28 = vstv %s516_s6 }
  0x1d   :  { %319 = vmatprep.subr.bf16.mxu0 %v438_v0  ;;  %327 = vmatprep.mubr.msk.bf16.mxu0 %vm439_vm0, %v438_v0  ;;  %v360_v3 = vld [vmem:[#allocation6 + $0x18] sm:$0xff]   ;;  %v358_v4 = vld [vmem:[#allocation3 + $0x8] sm:$0xff]   ;;  %v361_v5 = vld [vmem:[#allocation6 + $0x10] sm:$0xff]   ;;  %vm98_vm1 = vcmask 523264   ;;  %vm277_vm2 = vcmask 57344  }
  0x1e   :  { %331 = vmatprep.subr.bf16.mxu1 %v438_v0  ;;  %339 = vmatprep.mubr.msk.bf16.mxu1 %vm439_vm0, %v438_v0  ;;  %v359_v6 = vld [vmem:[#allocation3] sm:$0xff]   ;;  %v362_v9 = vld [vmem:[#allocation6 + $0x8] sm:$0xff]  }
  0x1f   :  { %320 = vmatpush3.bf16.msra.mxu0 %v356_v1  ;;  %332 = vmatpush3.bf16.msra.mxu1 %v360_v3  ;;  %v57_v7 = vld [vmem:[%s510_s0] sm:$0xff] }
  0x20   :  { %321 = vmatprep.subr.bf16.mxu0 %v438_v0  ;;  %333 = vmatprep.subr.bf16.mxu1 %v438_v0  ;;  %v58_v8 = vpack.c.bf16 %v57_v7, %v57_v7  ;;  %v363_v10 = vld [vmem:[#allocation6] sm:$0xff]  }
  0x21   :  { %v295_v11 = vld [vmem:[%s512_s2] ss:$0 sm:$0xff] }
  0x22   :  { %v301_v19 = vld [vmem:[%s514_s4] ss:$0 sm:$0xff]  ;;  %s440_s4 = smov [#allocation8]  }
  0x23   :  { %322 = vmatpush3.bf16.msra.mxu0 %v357_v2  ;;  %334 = vmatpush3.bf16.msra.mxu1 %v361_v5  ;;  %v228_v27 = vld [vmem:[%s515_s5] sm:$0x1]  ;;  %s285_s19 = sshll.u32 %s440_s4, 4  ;;  %s286_s19 = int_to_ptr.vmem [resolvable:$true] %s285_s19 }
  0x24   :  { %323 = vmatprep.subr.bf16.mxu0 %v438_v0  ;;  %335 = vmatprep.subr.bf16.mxu1 %v438_v0  ;;  %s408_s5 = scalar_lea.vmem %s286_s19, 16  ;;  %s412_s6 = scalar_lea.vmem %s286_s19, 32 }
  0x25   :  { %p409_p10 = scmp.ne.s32.totalorder %s286_s19, %s408_s5  ;;  %p413_p11 = scmp.lt.s32.totalorder %s286_s19, %s286_s19 }
  0x26   :  { %p414_p12 = scmp.lt.s32.totalorder %s412_s6, %s408_s5 }
  0x27   :  { %324 = vmatpush3.bf16.msra.mxu0 %v358_v4  ;;  %336 = vmatpush3.bf16.msra.mxu1 %v362_v9 }
  0x28   :  { %325 = vmatprep.subr.bf16.mxu0 %v438_v0  ;;  %337 = vmatprep.subr.bf16.mxu1 %v438_v0  ;;  %p415_p13 = por %p414_p12, %p413_p11 }
  0x2a   :  { %p416_p0 = pnand %p415_p13, %p409_p10 }
  0x2b   :  { %326 = vmatpush3.bf16.msra.mxu0 %v359_v6  ;;  %338 = vmatpush3.bf16.msra.mxu1 %v363_v10 }
  0x2c   :  { %343 = vmatprep.subr.bf16.mxu0 %v438_v0 }
  0x2e   :  { %328 = vmatmul.mubr.msk.bf16.vlgmr.msra.gmra.mxu0 %vm98_vm1, %v58_v8 }
  0x2f   :  { %345 = vmatprep.mubr.msk.bf16.mxu0 %vm439_vm0, %v438_v0 }
  0xee   :  { %v136_v12 = vpop.f32.mrf.mxu0 }
  0xef   :  { %v137_v13 = vadd.f32 %v295_v11, %v136_v12 }
  0xf0   :  { %v329_v14 = vpop.f32.mrf.mxu0 }
  0xf1   :  { %v142_v15 = vmax.f32 %v137_v13, 0.0 }
  0xf2   :  { %v139_v16 = vpop.f32.mrf.mxu0 }
  0xf3   :  { %v143_v17 = vpack.c.bf16 %v142_v15, %v142_v15 }
  0xf4   :  { %v330_v18 = vpop.f32.mrf.mxu0 }
  0xf5   :  { %340 = vmatmul.mubr.msk.bf16.vlgmr.msra.gmra.mxu1 %vm98_vm1, %v143_v17 }
 0x1b5   :  { %v220_v20 = vpop.f32.mrf.mxu1 }
 0x1b6   :  { %v221_v21 = vadd.f32 %v301_v19, %v220_v20 }
 0x1b7   :  { %v341_v22 = vpop.f32.mrf.mxu1 }
 0x1b8   :  { %v226_v23 = vmax.f32 %v221_v21, 0.0 }
 0x1b9   :  { %v223_v24 = vpop.f32.mrf.mxu1 }
 0x1ba   :  { %v227_v25 = vpack.c.bf16 %v226_v23, %v226_v23 }
 0x1bb   :  { %v342_v26 = vpop.f32.mrf.mxu1 }
 0x1bc   :  { %344 = vmatpush3.bf16.xpose.msra.mxu0 %v227_v25 }
 0x1c3   :  { %346 = vmatmul.mubr.bf16.vlgmr.msra.gmra.mxu0 %v228_v27 }
 0x283   :  { %v265_v29 = vpop.f32.mrf.mxu0 }
 0x284   :  { %v266_v30 = vadd.f32 %v265_v29, %v230_v28 }
 0x285   :  { %v347_v31 = vpop.f32.mrf.mxu0 }
 0x286   :  { %v271_v32 = vsub.f32 0.0, %v266_v30 }
 0x287   :  { %v268_v33 = vpop.f32.mrf.mxu0 }
 0x288   :  { %v272_v34 = vmul.f32 1.442695, %v271_v32 }
 0x289   :  { %v348_v35 = vpop.f32.mrf.mxu0 }
 0x28a   :  { %364 = vpow2.f32 %v272_v34 }
 0x297   :  { %v365_v36 = vpop.eup %364 }
 0x298   :  { %v274_v37 = vadd.f32 1.0, %v365_v36 }
 0x29a   :  { %366 = vrcp.f32 %v274_v37 }
 0x2a7   :  { %v367_v38 = vpop.eup %366 }
 0x2a8   :  { %278 = vst.msk [vmem:[#allocation8] sm:$0x1] %vm277_vm2, %v367_v38 }
 0x2a9   :  { %419 = shalt.err (!%p416_p0)
}
 0x2aa   :  { %288 = dma.vmem_to_hbm [thread:$0]  %s286_s19, 16, %s517_s7, [#allocation5]  }
 0x2ab   :  { %432 = dma.done.wait [#allocation5], 16  }
 0x2ac   :  { %433 = vsyncadd [#allocation5], 4294967280 }
 0x2ad   :  { %292 = vsyncpa [#allocation4], 1 }
 0x2ae   :  { %293 = vsyncpa [#allocation7], 1 }
 0x2af   :  { %294 = vsyncpa [#allocation5], 1 }

</bundles_post_ra>
